<compile_context>
chip_gen: v7x
topology: tpu7x:2x2x1
jax: 0.10.0
libtpu: 0.0.40
codegen_flags: <defaults>
</compile_context>

<pallas_src>
import jax
import jax.numpy as jnp
from jax.experimental import pallas as pl
from jax.experimental.pallas import tpu as pltpu


def _spatial_attention_kernel(x_ref, w_ref, b_ref, o_ref):
    # x_ref: (bn, C, thw) VMEM   w_ref: (C, 1) VMEM   b_ref: (1,) SMEM   o_ref: (bn, thw) VMEM
    x = x_ref[...]                                   # (bn, C, thw), lane-dense spatial axis
    w = w_ref[...]                                   # (C, 1) -> lane-broadcast over thw (VPU)
    prod = (x * w).astype(jnp.float32)               # per-channel scale; f32 accumulate
    s = jnp.sum(prod, axis=1) + b_ref[0]             # sublane reduce over C -> (bn, thw)
    o_ref[...] = jax.nn.sigmoid(s).astype(o_ref.dtype)


def _choose_tiling(N, C, HW, itemsize, budget_bytes):
    """Pick (bn, thw) for x blocks of shape (bn, C, thw) under a VMEM budget.

    Legality: the 2-D output block is (bn, thw), so bn must be a multiple of 8 or
    equal N, and thw must be a multiple of 128 or equal HW.  The x block's trailing
    dims (C, thw) are then automatically legal (C == 32).
    """
    col_bytes = C * itemsize                          # bytes of one (batch, pixel) column

    # 1) Everything fits in a single block.
    if N * HW * col_bytes <= budget_bytes:
        return N, HW

    # 2) Full spatial extent fits: pack sublane-aligned groups of batch elements.
    bn_fit = budget_bytes // (HW * col_bytes)
    if bn_fit >= 8:
        return (bn_fit // 8) * 8, HW

    # 3) Large feature map: small batch group, lane-aligned spatial tile (ragged
    #    last tile handled by the cdiv grid + Pallas masking -- no fallback block).
    bn = N if N < 8 else 8
    thw = (budget_bytes // (bn * col_bytes)) // 128 * 128
    thw = max(128, min(thw, HW))
    return bn, thw


def spatial_attention(x_nchw, weight, bias, *, vmem_block_budget=4 * 1024 * 1024):
    """x_nchw: (N, 32, H, W); weight: (1, 32, 1, 1); bias: (1,). Returns (N, 1, H, W)."""
    N, C, H, W = x_nchw.shape
    assert C == 32, "SpatialAttention expects 32 input channels"
    HW = H * W
    itemsize = jnp.dtype(x_nchw.dtype).itemsize

    bn, thw = _choose_tiling(N, C, HW, itemsize, vmem_block_budget)
    grid = (pl.cdiv(N, bn), pl.cdiv(HW, thw))

    x3 = x_nchw.reshape(N, C, HW)                           # free reshape, no HBM transpose
    w_col = weight.reshape(C, 1).astype(x_nchw.dtype)       # match x dtype (no big promotion)
    b = bias.reshape(1).astype(jnp.float32)

    out = pl.pallas_call(
        _spatial_attention_kernel,
        out_shape=jax.ShapeDtypeStruct((N, HW), x_nchw.dtype),
        grid_spec=pltpu.PrefetchScalarGridSpec(
            num_scalar_prefetch=0,
            grid=grid,
            in_specs=[
                # activation tile: bn batch elements, all channels, thw lane-dense cols
                pl.BlockSpec((bn, C, thw), lambda i, j: (i, 0, j)),
                # conv weight: constant block, stays resident across grid steps
                pl.BlockSpec((C, 1), lambda i, j: (0, 0)),
                # bias: single scalar, kept out of the VMEM pipeline
                pl.BlockSpec(memory_space=pltpu.MemorySpace.SMEM),
            ],
            # lane-dense, sublane-dense 2-D output block
            out_specs=pl.BlockSpec((bn, thw), lambda i, j: (i, j)),
        ),
        compiler_params=pltpu.CompilerParams(
            dimension_semantics=("parallel", "parallel"),
        ),
        cost_estimate=pl.CostEstimate(
            flops=2 * N * C * HW,
            transcendentals=N * HW,
            bytes_accessed=(N * C * HW + N * HW) * itemsize + (C + 1) * 4,
        ),
    )(x3, w_col, b)

    # glue: (N, HW) -> (N, 1, H, W) -- free reshape
    return out.reshape(N, 1, H, W)


def spatial_attention_ref(x_nchw, weight, bias):
    # Pure-JAX reference of the PyTorch forward.
    w = weight.reshape(1, 32)                               # (1, C)
    y = jnp.einsum("oc,nchw->nohw", w, x_nchw) + bias.reshape(1, 1, 1, 1)
    return jax.nn.sigmoid(y)


def _check(x, weight, bias, **kw):
    out = jax.block_until_ready(spatial_attention(x, weight, bias, **kw))
    ref = spatial_attention_ref(x, weight, bias)
    assert out.shape == ref.shape
    assert jnp.allclose(out, ref, atol=1e-5, rtol=1e-5)
    return out


if __name__ == "__main__":
    key = jax.random.PRNGKey(0)
    kx, kw, kb, k2, k3 = jax.random.split(key, 5)

    # Deterministic synthetic params (Conv2d(32, 1, 1): weight (1,32,1,1), bias (1,))
    weight = jax.random.normal(kw, (1, 32, 1, 1), dtype=jnp.float32) * 0.1
    bias = jax.random.normal(kb, (1,), dtype=jnp.float32) * 0.1

    # 1) Small-shape case consistent with the module: batch=2, channels=32, 16x16.
    x = jax.random.normal(kx, (2, 32, 16, 16), dtype=jnp.float32)
    out = _check(x, weight, bias)
    assert out.shape == (2, 1, 16, 16)

    # 2) Batch-packed path with a ragged batch block (bn=32, grid=(2,1)).
    x2 = jax.random.normal(k2, (40, 32, 32, 32), dtype=jnp.float32)
    _check(x2, weight, bias)

    # 3) Spatially tiled path with ragged spatial blocks (small budget to exercise
    #    the cdiv/masking path cheaply; HW=33*33 is not a multiple of 128).
    x3 = jax.random.normal(k3, (4, 32, 33, 33), dtype=jnp.float32)
    _check(x3, weight, bias, vmem_block_budget=256 * 1024)

    print("KERNEL_OK")
</pallas_src>

<mosaic_0001>
module attributes {stable_mosaic.version = 11 : i64} {
  func.func @_spatial_attention_kernel(%arg0: i32, %arg1: i32, %arg2: memref<2x32x256xf32, #tpu.memory_space<vmem>>, %arg3: memref<32x1xf32, #tpu.memory_space<vmem>>, %arg4: memref<1xf32, #tpu.memory_space<smem>>, %arg5: memref<2x256xf32, #tpu.memory_space<vmem>>) attributes {dimension_semantics = [#tpu.dimension_semantics<parallel>, #tpu.dimension_semantics<parallel>], iteration_bounds = array<i64: 1, 1>, scalar_prefetch = 0 : i64, scratch_operands = 0 : i64, tpu.core_type = #tpu.core_type<tc>, window_params = [{transform_indices = @transform_0, window_bounds = array<i64: 2, 32, 256>}, {pipeline_mode = #tpu.pipeline_mode<synchronous>, transform_indices = @transform_1, window_bounds = array<i64: 32, 1>}, {transform_indices = @transform_2, window_bounds = array<i64: 1>}, {transform_indices = @transform_3, window_bounds = array<i64: 2, 256>}]} {
    %c0 = arith.constant 0 : index
    %c0_0 = arith.constant 0 : index
    %c0_1 = arith.constant 0 : index
    %0 = vector.load %arg2[%c0, %c0_0, %c0_1] : memref<2x32x256xf32, #tpu.memory_space<vmem>>, vector<2x32x256xf32>
    %c0_2 = arith.constant 0 : index
    %c0_3 = arith.constant 0 : index
    %1 = vector.load %arg3[%c0_2, %c0_3] : memref<32x1xf32, #tpu.memory_space<vmem>>, vector<32x1xf32>
    %2 = vector.shape_cast %1 : vector<32x1xf32> to vector<1x32x1xf32>
    %3 = vector.broadcast %2 : vector<1x32x1xf32> to vector<2x32x256xf32>
    %4 = arith.mulf %0, %3 : vector<2x32x256xf32>
    %cst = arith.constant dense<0.000000e+00> : vector<2x256xf32>
    %5 = vector.multi_reduction <add>, %4, %cst [1] : vector<2x32x256xf32> to vector<2x256xf32>
    %c0_4 = arith.constant 0 : index
    %6 = memref.load %arg4[%c0_4] : memref<1xf32, #tpu.memory_space<smem>>
    %7 = vector.broadcast %6 : f32 to vector<2x256xf32>
    %8 = arith.addf %5, %7 : vector<2x256xf32>
    %9 = arith.negf %8 : vector<2x256xf32>
    %10 = math.exp %9 : vector<2x256xf32>
    %cst_5 = arith.constant 1.000000e+00 : f32
    %11 = vector.broadcast %cst_5 : f32 to vector<2x256xf32>
    %12 = arith.addf %11, %10 : vector<2x256xf32>
    %13 = arith.divf %11, %12 : vector<2x256xf32>
    %c0_6 = arith.constant 0 : index
    %c0_7 = arith.constant 0 : index
    %14 = vector.load %arg5[%c0_6, %c0_7] : memref<2x256xf32, #tpu.memory_space<vmem>>, vector<2x256xf32>
    tpu.vector_store %arg5[%c0_6, %c0_7], %13 {strides = array<i32>} : memref<2x256xf32, #tpu.memory_space<vmem>>, vector<2x256xf32>,
    return
  }
  func.func @transform_0(%arg0: i32, %arg1: i32) -> (i32, i32, i32) {
    %c0_i32 = arith.constant 0 : i32
    %c0_i32_0 = arith.constant 0 : i32
    return %arg0, %c0_i32, %arg1 : i32, i32, i32
  }
  func.func @transform_1(%arg0: i32, %arg1: i32) -> (i32, i32) {
    %c0_i32 = arith.constant 0 : i32
    %c0_i32_0 = arith.constant 0 : i32
    %c0_i32_1 = arith.constant 0 : i32
    return %c0_i32, %c0_i32_0 : i32, i32
  }
  func.func @transform_2(%arg0: i32, %arg1: i32) -> i32 {
    %c0_i32 = arith.constant 0 : i32
    %c0_i32_0 = arith.constant 0 : i32
    return %c0_i32 : i32
  }
  func.func @transform_3(%arg0: i32, %arg1: i32) -> (i32, i32) {
    %c0_i32 = arith.constant 0 : i32
    return %arg0, %arg1 : i32, i32
  }
}

</mosaic_0001>

<bundles_post_ra>
// kernel: tpu_custom_call.1
= control target key start
LH: loop header
LB: loop body
LE: loop exit
PB: predicated region body
PF: predicated region fallthrough
CT: control target
= control target key end

     0   :  { %9 = vsyncpa [#allocation4], 0  ;;  %s343_s0 = inlined_call_operand.hbm [shape: f32[2,32,256], index: 0, kind: input, shape index: {}]   ;;  %s344_s1 = inlined_call_operand.vmem [shape: f32[32,1], index: 1, kind: input, shape index: {}]   ;;  %s345_s2 = inlined_call_operand.<no memory space> [shape: f32[1], index: 2, kind: input, shape index: {}]   ;;  %s346_s3 = inlined_call_operand.hbm [shape: f32[2,256], index: 3, kind: output, shape index: {}]  }
   0x1   :  { %10 = vsyncpa [#allocation5], 0  ;;  %s278_s12 = smov [#allocation3]   ;;  %s230_s16 = scalar_lea.hbm %s343_s0, 2048 }
   0x2   :  { %s16_s13 = sshll.u32 %s278_s12, 4  ;;  %p231_p0 = scmp.ne.s32.totalorder %s343_s0, %s230_s16  ;;  %s17_s13 = int_to_ptr.vmem [resolvable:$true] %s16_s13 }
   0x3   :  { %p234_p1 = scmp.lt.u32.totalorder %s230_s16, %s343_s0 }
   0x5   :  { %p236_p2 = pnand %p234_p1, %p231_p0 }
   0x7   :  { %239 = shalt.err (!%p236_p2)
}
   0x8   :  { %s240_s21 = scalar_lea.vmem %s17_s13, 2048  ;;  %p245_p4 = scmp.lt.s32.totalorder %s17_s13, %s17_s13 }
   0x9   :  { %p241_p3 = scmp.ne.s32.totalorder %s17_s13, %s240_s21  ;;  %p246_p5 = scmp.lt.s32.totalorder %s240_s21, %s240_s21 }
   0xb   :  { %p247_p6 = por %p246_p5, %p245_p4 }
   0xd   :  { %p248_p7 = pnand %p247_p6, %p241_p3 }
   0xf   :  { %251 = shalt.err (!%p248_p7)
}
  0x10   :  { %s279_s22 = smov 256   ;;  %s280_s23 = smov 16  }
  0x11   :  { %22 = dma.hbm_to_vmem [thread:$0]  %s343_s0, 2048, %s17_s13, [#allocation4], %s279_s22, %s279_s22, %s280_s23  }
  0x12   :  { %274 = dma.done.wait [#allocation4], 2048  }
  0x13   :  { %275 = vsyncadd [#allocation4], 4294965248  ;;  %v281_v0 = vmov 0   ;;  %v48_v1 = vld [vmem:[%s344_s1 + $0x10] sm:$0xff]  ;;  %v46_v2 = vld [vmem:[%s344_s1] sm:$0xff]  ;;  %vm177_vm0 = vcmask 1041409  }
  0x14   :  { %213 = vset.pattern.permute.xlu1 %v281_v0  ;;  %212 = vset.pattern.permute.xlu0 %v281_v0  ;;  %v49_v3 = vld [vmem:[%s344_s1 + $0x18] sm:$0xff]  ;;  %v47_v4 = vld [vmem:[%s344_s1 + $0x8] sm:$0xff]  ;;  %v30_v7 = vld [vmem:[#allocation3] sm:$0xff]  ;;  %vm179_vm1 = vcmask 1043459   ;;  %vm181_vm2 = vcmask 1045509   ;;  %vm183_vm3 = vcmask 1047559  }
  0x15   :  { %62 = vperm.xlu1 %213, %v48_v1   ;;  %52 = vperm.xlu0 %212, %v46_v2   ;;  %v31_v8 = vld [vmem:[#allocation3 + $0x8] sm:$0xff]  ;;  %v34_v9 = vld [vmem:[#allocation3 + $0x20] sm:$0xff]  ;;  %v32_v12 = vld [vmem:[#allocation3 + $0x10] sm:$0xff] }
  0x16   :  { %v38_v10 = vld [vmem:[#allocation3 + $0x40] sm:$0xff]  ;;  %v39_v11 = vld [vmem:[#allocation3 + $0x48] sm:$0xff]  ;;  %v33_v13 = vld [vmem:[#allocation3 + $0x18] sm:$0xff] }
  0x17   :  { %v40_v14 = vld [vmem:[#allocation3 + $0x50] sm:$0xff]  ;;  %v41_v15 = vld [vmem:[#allocation3 + $0x58] sm:$0xff]  ;;  %v35_v16 = vld [vmem:[#allocation3 + $0x28] sm:$0xff] }
  0x18   :  { %v42_v17 = vld [vmem:[#allocation3 + $0x60] sm:$0xff]  ;;  %v43_v18 = vld [vmem:[#allocation3 + $0x68] sm:$0xff]  ;;  %v36_v24 = vld [vmem:[#allocation3 + $0x30] sm:$0xff] }
  0x19   :  { %67 = vperm.xlu1 %213, %v49_v3   ;;  %57 = vperm.xlu0 %212, %v47_v4   ;;  %v37_v26 = vld [vmem:[#allocation3 + $0x38] sm:$0xff]  ;;  %v44_v27 = vld [vmem:[#allocation3 + $0x70] sm:$0xff] }
  0x1a   :  { %v45_v28 = vld [vmem:[#allocation3 + $0x78] sm:$0xff] }
  0x94   :  { %v63_v5 = vpop.permute.xlu1 %62  ;;  %v53_v6 = vpop.permute.xlu0 %52 }
  0x95   :  { %v70_v20 = vmul.f32 %v53_v6, %v30_v7  ;;  %v71_v21 = vmul.f32 %v53_v6, %v31_v8  ;;  %v78_v22 = vmul.f32 %v53_v6, %v38_v10  ;;  %v79_v23 = vmul.f32 %v53_v6, %v39_v11 }
  0x96   :  { %v74_v33 = vmul.f32 %v63_v5, %v34_v9  ;;  %v75_v34 = vmul.f32 %v63_v5, %v35_v16  ;;  %v82_v35 = vmul.f32 %v63_v5, %v42_v17  ;;  %v83_v36 = vmul.f32 %v63_v5, %v43_v18 }
  0x97   :  { %v123_v9 = vstv %s345_s2  ;;  %s283_s2 = smov [#allocation6]  }
  0x98   :  { %v58_v19 = vpop.permute.xlu0 %57  ;;  %v68_v25 = vpop.permute.xlu1 %67  ;;  %s193_s7 = sshll.u32 %s283_s2, 4  ;;  %s194_s7 = int_to_ptr.vmem [resolvable:$true] %s193_s7 }
  0x99   :  { %v72_v29 = vmul.f32 %v58_v19, %v32_v12  ;;  %v73_v30 = vmul.f32 %v58_v19, %v33_v13  ;;  %v80_v31 = vmul.f32 %v58_v19, %v40_v14  ;;  %v81_v32 = vmul.f32 %v58_v19, %v41_v15  ;;  %s252_s8 = scalar_lea.vmem %s194_s7, 64  ;;  %p257_p9 = scmp.lt.s32.totalorder %s194_s7, %s194_s7 }
  0x9a   :  { %v76_v41 = vmul.f32 %v68_v25, %v36_v24  ;;  %v77_v42 = vmul.f32 %v68_v25, %v37_v26  ;;  %v84_v43 = vmul.f32 %v68_v25, %v44_v27  ;;  %v85_v44 = vmul.f32 %v68_v25, %v45_v28  ;;  %p253_p8 = scmp.ne.s32.totalorder %s194_s7, %s252_s8  ;;  %p258_p10 = scmp.lt.s32.totalorder %s252_s8, %s252_s8 }
  0x9b   :  { %v86_v37 = vadd.f32 %v72_v29, %v70_v20  ;;  %v95_v38 = vadd.f32 %v73_v30, %v71_v21  ;;  %v104_v39 = vadd.f32 %v80_v31, %v78_v22  ;;  %v113_v40 = vadd.f32 %v81_v32, %v79_v23 }
  0x9c   :  { %v282_v30 = vmov 1983009808   ;;  %v160_v32 = vlaneseq  ;;  %p259_p11 = por %p258_p10, %p257_p9 }
  0x9d   :  { %v87_v45 = vadd.f32 %v86_v37, %v74_v33  ;;  %v96_v46 = vadd.f32 %v95_v38, %v75_v34  ;;  %v105_v47 = vadd.f32 %v104_v39, %v82_v35  ;;  %v114_v48 = vadd.f32 %v113_v40, %v83_v36 }
  0x9e   :  { %v158_v31 = vunpack.c.l.s4 %v282_v30  ;;  %v161_v34 = vshrl.u32 %v160_v32, 7  ;;  %p260_p12 = pnand %p259_p11, %p253_p8 }
  0x9f   :  { %v88_v49 = vadd.f32 %v87_v45, %v76_v41  ;;  %v97_v50 = vadd.f32 %v96_v46, %v77_v42  ;;  %v106_v51 = vadd.f32 %v105_v47, %v84_v43  ;;  %v115_v52 = vadd.f32 %v114_v48, %v85_v44 }
  0xa0   :  { %v159_v33 = vunpack.c.0.s8 %v158_v31 }
  0xa1   :  { %v89_v53 = vrot.slane %v88_v49, 4  ;;  %v98_v54 = vrot.slane %v97_v50, 4  ;;  %v107_v55 = vrot.slane %v106_v51, 4  ;;  %v116_v56 = vrot.slane %v115_v52, 4 }
  0xa2   :  { %v162_v38 = vsub.s32 %v159_v33, %v161_v34 }
  0xa3   :  { %v90_v57 = vadd.f32 %v89_v53, %v88_v49  ;;  %v99_v58 = vadd.f32 %v98_v54, %v97_v50  ;;  %v108_v59 = vadd.f32 %v107_v55, %v106_v51  ;;  %v117_v60 = vadd.f32 %v116_v56, %v115_v52 }
  0xa5   :  { %v91_v61 = vrot.slane %v90_v57, 2  ;;  %v100_v62 = vrot.slane %v99_v58, 2  ;;  %v109_v63 = vrot.slane %v108_v59, 2  ;;  %v118_v0 = vrot.slane %v117_v60, 2 }
  0xa7   :  { %v92_v1 = vadd.f32 %v91_v61, %v90_v57  ;;  %v101_v2 = vadd.f32 %v100_v62, %v99_v58  ;;  %v110_v3 = vadd.f32 %v109_v63, %v108_v59  ;;  %v119_v4 = vadd.f32 %v118_v0, %v117_v60 }
  0xa9   :  { %v93_v5 = vrot.slane %v92_v1, 1  ;;  %v102_v6 = vrot.slane %v101_v2, 1  ;;  %v111_v7 = vrot.slane %v110_v3, 1  ;;  %v120_v8 = vrot.slane %v119_v4, 1 }
  0xab   :  { %v94_v10 = vadd.f32 %v93_v5, %v92_v1  ;;  %v103_v11 = vadd.f32 %v102_v6, %v101_v2  ;;  %v112_v12 = vadd.f32 %v111_v7, %v110_v3  ;;  %v121_v13 = vadd.f32 %v120_v8, %v119_v4 }
  0xad   :  { %v124_v14 = vadd.f32 %v123_v9, %v94_v10  ;;  %v125_v15 = vadd.f32 %v123_v9, %v103_v11  ;;  %v126_v16 = vadd.f32 %v123_v9, %v112_v12  ;;  %v127_v17 = vadd.f32 %v123_v9, %v121_v13 }
  0xaf   :  { %v202_v18 = vmul.f32 -1.442695, %v124_v14  ;;  %v203_v19 = vmul.f32 -1.442695, %v125_v15  ;;  %v204_v20 = vmul.f32 -1.442695, %v126_v16 }
  0xb0   :  { %v205_v21 = vmul.f32 -1.442695, %v127_v17 }
  0xb1   :  { %214 = vpow2.f32 %v202_v18 }
  0xb2   :  { %216 = vpow2.f32 %v203_v19 }
  0xb3   :  { %218 = vpow2.f32 %v204_v20 }
  0xb4   :  { %220 = vpow2.f32 %v205_v21 }
  0xbb   :  { %v215_v22 = vpop.eup %214 }
  0xbc   :  { %v217_v23 = vpop.eup %216  ;;  %v140_v24 = vadd.f32 1.0, %v215_v22 }
  0xbd   :  { %v219_v25 = vpop.eup %218  ;;  %v141_v26 = vadd.f32 1.0, %v217_v23 }
  0xbe   :  { %v221_v27 = vpop.eup %220  ;;  %v142_v28 = vadd.f32 1.0, %v219_v25  ;;  %222 = vrcp.f32 %v140_v24 }
  0xbf   :  { %v143_v29 = vadd.f32 1.0, %v221_v27  ;;  %224 = vrcp.f32 %v141_v26 }
  0xc0   :  { %226 = vrcp.f32 %v142_v28 }
  0xc1   :  { %228 = vrcp.f32 %v143_v29 }
  0xc8   :  { %v223_v35 = vpop.eup %222 }
  0xc9   :  { %v225_v36 = vpop.eup %224 }
  0xca   :  { %v227_v37 = vpop.eup %226  ;;  %v156_v40 = vcombine.low %v223_v35, %v225_v36 }
  0xcb   :  { %v229_v39 = vpop.eup %228 }
  0xcc   :  { %v164_v41 = vcombine.low %v227_v37, %v229_v39  ;;  %v163_v43 = vrot.slane %v156_v40, %v162_v38 }
  0xce   :  { %v171_v42 = vrot.slane %v164_v41, %v162_v38 }
  0xd0   :  { %v176_v44 = vrot.slane %v171_v42, 7 }
  0xd2   :  { %v178_v45 = vsel %vm177_vm0, %v176_v44, %v163_v43 }
  0xd3   :  { %v180_v46 = vsel %vm179_vm1, %v176_v44, %v178_v45 }
  0xd4   :  { %v182_v47 = vsel %vm181_vm2, %v176_v44, %v180_v46 }
  0xd5   :  { %v184_v48 = vsel %vm183_vm3, %v176_v44, %v182_v47 }
  0xd6   :  { %186 = vst [vmem:[#allocation6] sm:$0xf] %v184_v48 }
  0xd7   :  { %263 = shalt.err (!%p260_p12)
}
  0xd8   :  { %s264_s11 = scalar_lea.hbm %s346_s3, 64 }
  0xd9   :  { %p265_p13 = scmp.ne.s32.totalorder %s346_s3, %s264_s11  ;;  %p268_p0 = scmp.lt.u32.totalorder %s264_s11, %s346_s3 }
  0xdb   :  { %p270_p1 = pnand %p268_p0, %p265_p13 }
  0xdd   :  { %273 = shalt.err (!%p270_p1)
}
  0xde   :  { %196 = dma.vmem_to_hbm [thread:$0]  %s194_s7, 64, %s346_s3, [#allocation5]  }
  0xdf   :  { %276 = dma.done.wait [#allocation5], 64  }
  0xe0   :  { %277 = vsyncadd [#allocation5], 4294967232 }
  0xe1   :  { %200 = vsyncpa [#allocation4], 1 }
  0xe2   :  { %201 = vsyncpa [#allocation5], 1 }

</bundles_post_ra>
